<compile_context>
chip_gen: v7x
topology: tpu7x:2x2x1
jax: 0.10.0
libtpu: 0.0.40
codegen_flags: <defaults>
</compile_context>

<pallas_src>
import jax
import jax.numpy as jnp
import numpy as np
from jax.experimental import pallas as pl
from jax.experimental.pallas import tpu as pltpu


# ---------------------------------------------------------------------------
# Fused kernel: standardize state / next_state / action / next_action
#   data blocks:   (tb, Ds) or (tb, Da)
#   param blocks:  (1, Ds)  or (1, Da)   (resident, broadcast over sublanes)
# ---------------------------------------------------------------------------
def _fused_preprocess_kernel(
    s_x_ref, s_p_ref, ns_x_ref, ns_p_ref,
    a_x_ref, a_p_ref, na_x_ref, na_p_ref,
    s_mean_ref, s_istd_ref, a_mean_ref, a_istd_ref,
    s_out_ref, ns_out_ref, a_out_ref, na_out_ref,
):
    s_mean = s_mean_ref[...]
    s_istd = s_istd_ref[...]
    a_mean = a_mean_ref[...]
    a_istd = a_istd_ref[...]
    # (x - mean) / std, zeroed where the feature is absent
    s_out_ref[...] = (s_x_ref[...] - s_mean) * s_istd * s_p_ref[...]
    ns_out_ref[...] = (ns_x_ref[...] - s_mean) * s_istd * ns_p_ref[...]
    a_out_ref[...] = (a_x_ref[...] - a_mean) * a_istd * a_p_ref[...]
    na_out_ref[...] = (na_x_ref[...] - a_mean) * a_istd * na_p_ref[...]


def _choose_batch_tile(B, Ds, Da, *, max_tb=1024, vmem_budget_bytes=24 << 20):
    # Streamed f32 arrays per batch-row: 6 of width Ds (x / presence / out for
    # state & next_state) + 6 of width Da, each double-buffered by BlockSpec.
    bytes_per_row = (6 * Ds + 6 * Da) * 4 * 2
    tb = max(8, min(max_tb, vmem_budget_bytes // bytes_per_row))
    tb = max(8, (tb // 8) * 8)               # sublane-align the tile
    b_pad8 = ((B + 7) // 8) * 8
    tb = min(tb, b_pad8)                     # don't tile past the (padded) batch
    return tb


def parametric_dqn_preprocess(
    state_x, state_p, next_state_x, next_state_p,
    action_x, action_p, next_action_x, next_action_p,
    s_mean, s_istd, a_mean, a_istd,
):
    B, Ds = state_x.shape
    _, Da = action_x.shape

    tb = _choose_batch_tile(B, Ds, Da)
    n_tiles = pl.cdiv(B, tb)
    Bp = n_tiles * tb

    def pad_b(x):
        return x if Bp == B else jnp.pad(x, ((0, Bp - B), (0, 0)))

    data = [pad_b(x) for x in (state_x, state_p, next_state_x, next_state_p,
                               action_x, action_p, next_action_x, next_action_p)]

    def data_spec(d):
        return pl.BlockSpec((tb, d), lambda i: (i, 0))

    def param_spec(d):
        return pl.BlockSpec((1, d), lambda i: (0, 0))

    widths = (Ds, Ds, Ds, Ds, Da, Da, Da, Da)
    outs = pl.pallas_call(
        _fused_preprocess_kernel,
        out_shape=(
            jax.ShapeDtypeStruct((Bp, Ds), jnp.float32),
            jax.ShapeDtypeStruct((Bp, Ds), jnp.float32),
            jax.ShapeDtypeStruct((Bp, Da), jnp.float32),
            jax.ShapeDtypeStruct((Bp, Da), jnp.float32),
        ),
        grid=(n_tiles,),
        in_specs=[data_spec(d) for d in widths]
        + [param_spec(Ds), param_spec(Ds), param_spec(Da), param_spec(Da)],
        out_specs=(data_spec(Ds), data_spec(Ds), data_spec(Da), data_spec(Da)),
        compiler_params=pltpu.CompilerParams(dimension_semantics=("parallel",)),
    )(*data, s_mean, s_istd, a_mean, a_istd)

    if Bp != B:
        outs = tuple(o[:B] for o in outs)
    return outs


# ---------------------------------------------------------------------------
# Full forward (returns a dict mirroring rlt.ParametricDqnInput fields)
# ---------------------------------------------------------------------------
def parametric_dqn_batch_preprocess(batch, s_mean, s_istd, a_mean, a_istd):
    state, next_state, action, next_action = parametric_dqn_preprocess(
        batch["state_features"], batch["state_features_presence"],
        batch["next_state_features"], batch["next_state_features_presence"],
        batch["action"], batch["action_presence"],
        batch["next_action"], batch["next_action_presence"],
        s_mean, s_istd, a_mean, a_istd,
    )
    # TODO(synk): rlt.ParametricDqnInput / rlt.FeatureData struct packing is
    # represented as a flat dict; batch_to_device is a no-op under JAX.
    return {
        "state": state,
        "next_state": next_state,
        "action": action,
        "next_action": next_action,
        "reward": batch["reward"][:, None],
        "time_diff": batch["time_diff"][:, None],
        "step": batch["step"][:, None],
        "not_terminal": batch["not_terminal"][:, None],
        "possible_actions": batch["possible_actions"],
        "possible_actions_mask": batch["possible_actions_mask"],
        "possible_next_actions": batch["possible_next_actions"],
        "possible_next_actions_mask": batch["possible_next_actions_mask"],
        "mdp_id": batch["mdp_id"][:, None],
        "sequence_number": batch["sequence_number"][:, None],
        "action_probability": batch["action_probability"][:, None],
    }


if __name__ == "__main__":
    B, Ds, Da, MAX_A = 16, 256, 128, 4
    key = jax.random.PRNGKey(0)
    ks = jax.random.split(key, 20)

    batch = {
        "state_features": jax.random.normal(ks[0], (B, Ds), jnp.float32) * 3.0 + 1.0,
        "state_features_presence": (jax.random.uniform(ks[1], (B, Ds)) > 0.1).astype(jnp.float32),
        "next_state_features": jax.random.normal(ks[2], (B, Ds), jnp.float32) * 3.0 - 0.5,
        "next_state_features_presence": (jax.random.uniform(ks[3], (B, Ds)) > 0.1).astype(jnp.float32),
        "action": jax.random.normal(ks[4], (B, Da), jnp.float32) * 2.0,
        "action_presence": (jax.random.uniform(ks[5], (B, Da)) > 0.1).astype(jnp.float32),
        "next_action": jax.random.normal(ks[6], (B, Da), jnp.float32) * 2.0 + 0.3,
        "next_action_presence": (jax.random.uniform(ks[7], (B, Da)) > 0.1).astype(jnp.float32),
        "reward": jax.random.normal(ks[8], (B,), jnp.float32),
        "time_diff": jnp.ones((B,), jnp.float32),
        "step": jnp.arange(B, dtype=jnp.float32),
        "not_terminal": (jax.random.uniform(ks[9], (B,)) > 0.2).astype(jnp.float32),
        "possible_actions": jax.random.normal(ks[10], (B, MAX_A, Da), jnp.float32),
        "possible_actions_mask": (jax.random.uniform(ks[11], (B, MAX_A)) > 0.3).astype(jnp.float32),
        "possible_next_actions": jax.random.normal(ks[12], (B, MAX_A, Da), jnp.float32),
        "possible_next_actions_mask": (jax.random.uniform(ks[13], (B, MAX_A)) > 0.3).astype(jnp.float32),
        "mdp_id": jnp.arange(B, dtype=jnp.int32),
        "sequence_number": jnp.arange(B, dtype=jnp.int32),
        "action_probability": jax.random.uniform(ks[14], (B,), jnp.float32),
    }

    # Deterministic synthetic Preprocessor parameters (per-feature mean / 1/std).
    s_mean = jax.random.normal(ks[15], (1, Ds), jnp.float32)
    s_istd = 1.0 / jax.random.uniform(ks[16], (1, Ds), jnp.float32, minval=0.5, maxval=2.0)
    a_mean = jax.random.normal(ks[17], (1, Da), jnp.float32)
    a_istd = 1.0 / jax.random.uniform(ks[18], (1, Da), jnp.float32, minval=0.5, maxval=2.0)

    out = parametric_dqn_batch_preprocess(batch, s_mean, s_istd, a_mean, a_istd)
    jax.tree_util.tree_map(jax.block_until_ready, out)

    # --- reference check (pure JAX / numpy) ---
    ref_state = (batch["state_features"] - s_mean) * s_istd * batch["state_features_presence"]
    ref_next_state = (batch["next_state_features"] - s_mean) * s_istd * batch["next_state_features_presence"]
    ref_action = (batch["action"] - a_mean) * a_istd * batch["action_presence"]
    ref_next_action = (batch["next_action"] - a_mean) * a_istd * batch["next_action_presence"]

    np.testing.assert_allclose(np.asarray(out["state"]), np.asarray(ref_state), rtol=1e-5, atol=1e-5)
    np.testing.assert_allclose(np.asarray(out["next_state"]), np.asarray(ref_next_state), rtol=1e-5, atol=1e-5)
    np.testing.assert_allclose(np.asarray(out["action"]), np.asarray(ref_action), rtol=1e-5, atol=1e-5)
    np.testing.assert_allclose(np.asarray(out["next_action"]), np.asarray(ref_next_action), rtol=1e-5, atol=1e-5)
    assert out["reward"].shape == (B, 1)
    assert out["not_terminal"].shape == (B, 1)
    assert out["mdp_id"].shape == (B, 1)
    assert out["possible_actions"].shape == (B, MAX_A, Da)

    print("KERNEL_OK")
</pallas_src>

<mosaic_0001>
module attributes {stable_mosaic.version = 11 : i64} {
  func.func @_fused_preprocess_kernel(%arg0: i32, %arg1: memref<16x256xf32, #tpu.memory_space<vmem>>, %arg2: memref<16x256xf32, #tpu.memory_space<vmem>>, %arg3: memref<16x256xf32, #tpu.memory_space<vmem>>, %arg4: memref<16x256xf32, #tpu.memory_space<vmem>>, %arg5: memref<16x128xf32, #tpu.memory_space<vmem>>, %arg6: memref<16x128xf32, #tpu.memory_space<vmem>>, %arg7: memref<16x128xf32, #tpu.memory_space<vmem>>, %arg8: memref<16x128xf32, #tpu.memory_space<vmem>>, %arg9: memref<1x256xf32, #tpu.memory_space<vmem>>, %arg10: memref<1x256xf32, #tpu.memory_space<vmem>>, %arg11: memref<1x128xf32, #tpu.memory_space<vmem>>, %arg12: memref<1x128xf32, #tpu.memory_space<vmem>>, %arg13: memref<16x256xf32, #tpu.memory_space<vmem>>, %arg14: memref<16x256xf32, #tpu.memory_space<vmem>>, %arg15: memref<16x128xf32, #tpu.memory_space<vmem>>, %arg16: memref<16x128xf32, #tpu.memory_space<vmem>>) attributes {dimension_semantics = [#tpu.dimension_semantics<parallel>], iteration_bounds = array<i64: 1>, scalar_prefetch = 0 : i64, scratch_operands = 0 : i64, tpu.core_type = #tpu.core_type<tc>, window_params = [{transform_indices = @transform_0, window_bounds = array<i64: 16, 256>}, {transform_indices = @transform_1, window_bounds = array<i64: 16, 256>}, {transform_indices = @transform_2, window_bounds = array<i64: 16, 256>}, {transform_indices = @transform_3, window_bounds = array<i64: 16, 256>}, {transform_indices = @transform_4, window_bounds = array<i64: 16, 128>}, {transform_indices = @transform_5, window_bounds = array<i64: 16, 128>}, {transform_indices = @transform_6, window_bounds = array<i64: 16, 128>}, {transform_indices = @transform_7, window_bounds = array<i64: 16, 128>}, {pipeline_mode = #tpu.pipeline_mode<synchronous>, transform_indices = @transform_8, window_bounds = array<i64: 1, 256>}, {pipeline_mode = #tpu.pipeline_mode<synchronous>, transform_indices = @transform_9, window_bounds = array<i64: 1, 256>}, {pipeline_mode = #tpu.pipeline_mode<synchronous>, transform_indices = @transform_10, window_bounds = array<i64: 1, 128>}, {pipeline_mode = #tpu.pipeline_mode<synchronous>, transform_indices = @transform_11, window_bounds = array<i64: 1, 128>}, {transform_indices = @transform_12, window_bounds = array<i64: 16, 256>}, {transform_indices = @transform_13, window_bounds = array<i64: 16, 256>}, {transform_indices = @transform_14, window_bounds = array<i64: 16, 128>}, {transform_indices = @transform_15, window_bounds = array<i64: 16, 128>}]} {
    %c0 = arith.constant 0 : index
    %c0_0 = arith.constant 0 : index
    %0 = vector.load %arg9[%c0, %c0_0] : memref<1x256xf32, #tpu.memory_space<vmem>>, vector<1x256xf32>
    %c0_1 = arith.constant 0 : index
    %c0_2 = arith.constant 0 : index
    %1 = vector.load %arg10[%c0_1, %c0_2] : memref<1x256xf32, #tpu.memory_space<vmem>>, vector<1x256xf32>
    %c0_3 = arith.constant 0 : index
    %c0_4 = arith.constant 0 : index
    %2 = vector.load %arg11[%c0_3, %c0_4] : memref<1x128xf32, #tpu.memory_space<vmem>>, vector<1x128xf32>
    %c0_5 = arith.constant 0 : index
    %c0_6 = arith.constant 0 : index
    %3 = vector.load %arg12[%c0_5, %c0_6] : memref<1x128xf32, #tpu.memory_space<vmem>>, vector<1x128xf32>
    %c0_7 = arith.constant 0 : index
    %c0_8 = arith.constant 0 : index
    %4 = vector.load %arg1[%c0_7, %c0_8] : memref<16x256xf32, #tpu.memory_space<vmem>>, vector<16x256xf32>
    %5 = vector.broadcast %0 : vector<1x256xf32> to vector<16x256xf32>
    %6 = arith.subf %4, %5 : vector<16x256xf32>
    %7 = vector.broadcast %1 : vector<1x256xf32> to vector<16x256xf32>
    %8 = arith.mulf %6, %7 : vector<16x256xf32>
    %c0_9 = arith.constant 0 : index
    %c0_10 = arith.constant 0 : index
    %9 = vector.load %arg2[%c0_9, %c0_10] : memref<16x256xf32, #tpu.memory_space<vmem>>, vector<16x256xf32>
    %10 = arith.mulf %8, %9 : vector<16x256xf32>
    %c0_11 = arith.constant 0 : index
    %c0_12 = arith.constant 0 : index
    %11 = vector.load %arg13[%c0_11, %c0_12] : memref<16x256xf32, #tpu.memory_space<vmem>>, vector<16x256xf32>
    tpu.vector_store %arg13[%c0_11, %c0_12], %10 {strides = array<i32>} : memref<16x256xf32, #tpu.memory_space<vmem>>, vector<16x256xf32>,
    %c0_13 = arith.constant 0 : index
    %c0_14 = arith.constant 0 : index
    %12 = vector.load %arg3[%c0_13, %c0_14] : memref<16x256xf32, #tpu.memory_space<vmem>>, vector<16x256xf32>
    %13 = vector.broadcast %0 : vector<1x256xf32> to vector<16x256xf32>
    %14 = arith.subf %12, %13 : vector<16x256xf32>
    %15 = vector.broadcast %1 : vector<1x256xf32> to vector<16x256xf32>
    %16 = arith.mulf %14, %15 : vector<16x256xf32>
    %c0_15 = arith.constant 0 : index
    %c0_16 = arith.constant 0 : index
    %17 = vector.load %arg4[%c0_15, %c0_16] : memref<16x256xf32, #tpu.memory_space<vmem>>, vector<16x256xf32>
    %18 = arith.mulf %16, %17 : vector<16x256xf32>
    %c0_17 = arith.constant 0 : index
    %c0_18 = arith.constant 0 : index
    %19 = vector.load %arg14[%c0_17, %c0_18] : memref<16x256xf32, #tpu.memory_space<vmem>>, vector<16x256xf32>
    tpu.vector_store %arg14[%c0_17, %c0_18], %18 {strides = array<i32>} : memref<16x256xf32, #tpu.memory_space<vmem>>, vector<16x256xf32>,
    %c0_19 = arith.constant 0 : index
    %c0_20 = arith.constant 0 : index
    %20 = vector.load %arg5[%c0_19, %c0_20] : memref<16x128xf32, #tpu.memory_space<vmem>>, vector<16x128xf32>
    %21 = vector.broadcast %2 : vector<1x128xf32> to vector<16x128xf32>
    %22 = arith.subf %20, %21 : vector<16x128xf32>
    %23 = vector.broadcast %3 : vector<1x128xf32> to vector<16x128xf32>
    %24 = arith.mulf %22, %23 : vector<16x128xf32>
    %c0_21 = arith.constant 0 : index
    %c0_22 = arith.constant 0 : index
    %25 = vector.load %arg6[%c0_21, %c0_22] : memref<16x128xf32, #tpu.memory_space<vmem>>, vector<16x128xf32>
    %26 = arith.mulf %24, %25 : vector<16x128xf32>
    %c0_23 = arith.constant 0 : index
    %c0_24 = arith.constant 0 : index
    %27 = vector.load %arg15[%c0_23, %c0_24] : memref<16x128xf32, #tpu.memory_space<vmem>>, vector<16x128xf32>
    tpu.vector_store %arg15[%c0_23, %c0_24], %26 {strides = array<i32>} : memref<16x128xf32, #tpu.memory_space<vmem>>, vector<16x128xf32>,
    %c0_25 = arith.constant 0 : index
    %c0_26 = arith.constant 0 : index
    %28 = vector.load %arg7[%c0_25, %c0_26] : memref<16x128xf32, #tpu.memory_space<vmem>>, vector<16x128xf32>
    %29 = vector.broadcast %2 : vector<1x128xf32> to vector<16x128xf32>
    %30 = arith.subf %28, %29 : vector<16x128xf32>
    %31 = vector.broadcast %3 : vector<1x128xf32> to vector<16x128xf32>
    %32 = arith.mulf %30, %31 : vector<16x128xf32>
    %c0_27 = arith.constant 0 : index
    %c0_28 = arith.constant 0 : index
    %33 = vector.load %arg8[%c0_27, %c0_28] : memref<16x128xf32, #tpu.memory_space<vmem>>, vector<16x128xf32>
    %34 = arith.mulf %32, %33 : vector<16x128xf32>
    %c0_29 = arith.constant 0 : index
    %c0_30 = arith.constant 0 : index
    %35 = vector.load %arg16[%c0_29, %c0_30] : memref<16x128xf32, #tpu.memory_space<vmem>>, vector<16x128xf32>
    tpu.vector_store %arg16[%c0_29, %c0_30], %34 {strides = array<i32>} : memref<16x128xf32, #tpu.memory_space<vmem>>, vector<16x128xf32>,
    return
  }
  func.func @transform_0(%arg0: i32) -> (i32, i32) {
    %c0_i32 = arith.constant 0 : i32
    %c0_i32_0 = arith.constant 0 : i32
    return %arg0, %c0_i32 : i32, i32
  }
  func.func @transform_1(%arg0: i32) -> (i32, i32) {
    %c0_i32 = arith.constant 0 : i32
    %c0_i32_0 = arith.constant 0 : i32
    return %arg0, %c0_i32 : i32, i32
  }
  func.func @transform_2(%arg0: i32) -> (i32, i32) {
    %c0_i32 = arith.constant 0 : i32
    %c0_i32_0 = arith.constant 0 : i32
    return %arg0, %c0_i32 : i32, i32
  }
  func.func @transform_3(%arg0: i32) -> (i32, i32) {
    %c0_i32 = arith.constant 0 : i32
    %c0_i32_0 = arith.constant 0 : i32
    return %arg0, %c0_i32 : i32, i32
  }
  func.func @transform_4(%arg0: i32) -> (i32, i32) {
    %c0_i32 = arith.constant 0 : i32
    %c0_i32_0 = arith.constant 0 : i32
    return %arg0, %c0_i32 : i32, i32
  }
  func.func @transform_5(%arg0: i32) -> (i32, i32) {
    %c0_i32 = arith.constant 0 : i32
    %c0_i32_0 = arith.constant 0 : i32
    return %arg0, %c0_i32 : i32, i32
  }
  func.func @transform_6(%arg0: i32) -> (i32, i32) {
    %c0_i32 = arith.constant 0 : i32
    %c0_i32_0 = arith.constant 0 : i32
    return %arg0, %c0_i32 : i32, i32
  }
  func.func @transform_7(%arg0: i32) -> (i32, i32) {
    %c0_i32 = arith.constant 0 : i32
    %c0_i32_0 = arith.constant 0 : i32
    return %arg0, %c0_i32 : i32, i32
  }
  func.func @transform_8(%arg0: i32) -> (i32, i32) {
    %c0_i32 = arith.constant 0 : i32
    %c0_i32_0 = arith.constant 0 : i32
    %c0_i32_1 = arith.constant 0 : i32
    return %c0_i32, %c0_i32_0 : i32, i32
  }
  func.func @transform_9(%arg0: i32) -> (i32, i32) {
    %c0_i32 = arith.constant 0 : i32
    %c0_i32_0 = arith.constant 0 : i32
    %c0_i32_1 = arith.constant 0 : i32
    return %c0_i32, %c0_i32_0 : i32, i32
  }
  func.func @transform_10(%arg0: i32) -> (i32, i32) {
    %c0_i32 = arith.constant 0 : i32
    %c0_i32_0 = arith.constant 0 : i32
    %c0_i32_1 = arith.constant 0 : i32
    return %c0_i32, %c0_i32_0 : i32, i32
  }
  func.func @transform_11(%arg0: i32) -> (i32, i32) {
    %c0_i32 = arith.constant 0 : i32
    %c0_i32_0 = arith.constant 0 : i32
    %c0_i32_1 = arith.constant 0 : i32
    return %c0_i32, %c0_i32_0 : i32, i32
  }
  func.func @transform_12(%arg0: i32) -> (i32, i32) {
    %c0_i32 = arith.constant 0 : i32
    %c0_i32_0 = arith.constant 0 : i32
    return %arg0, %c0_i32 : i32, i32
  }
  func.func @transform_13(%arg0: i32) -> (i32, i32) {
    %c0_i32 = arith.constant 0 : i32
    %c0_i32_0 = arith.constant 0 : i32
    return %arg0, %c0_i32 : i32, i32
  }
  func.func @transform_14(%arg0: i32) -> (i32, i32) {
    %c0_i32 = arith.constant 0 : i32
    %c0_i32_0 = arith.constant 0 : i32
    return %arg0, %c0_i32 : i32, i32
  }
  func.func @transform_15(%arg0: i32) -> (i32, i32) {
    %c0_i32 = arith.constant 0 : i32
    %c0_i32_0 = arith.constant 0 : i32
    return %arg0, %c0_i32 : i32, i32
  }
}

</mosaic_0001>

<bundles_post_ra>
// kernel: tpu_custom_call.1
= control target key start
LH: loop header
LB: loop body
LE: loop exit
PB: predicated region body
PF: predicated region fallthrough
CT: control target
= control target key end

     0   :  { %21 = vsyncpa [#allocation3], 0  ;;  %s920_s0 = inlined_call_operand.hbm [shape: f32[16,256], index: 0, kind: input, shape index: {}]   ;;  %s921_s1 = inlined_call_operand.hbm [shape: f32[16,256], index: 1, kind: input, shape index: {}]   ;;  %s922_s2 = inlined_call_operand.hbm [shape: f32[16,256], index: 2, kind: input, shape index: {}]   ;;  %s923_s3 = inlined_call_operand.hbm [shape: f32[16,256], index: 3, kind: input, shape index: {}]   ;;  %s924_s4 = inlined_call_operand.hbm [shape: f32[16,128], index: 4, kind: input, shape index: {}]   ;;  %s925_s5 = inlined_call_operand.vmem [shape: f32[16,128], index: 5, kind: input, shape index: {}]   ;;  %s926_s6 = inlined_call_operand.hbm [shape: f32[16,128], index: 6, kind: input, shape index: {}]   ;;  %s927_s7 = inlined_call_operand.hbm [shape: f32[16,128], index: 7, kind: input, shape index: {}]   ;;  %s928_s8 = inlined_call_operand.vmem [shape: f32[1,256], index: 8, kind: input, shape index: {}]   ;;  %s929_s9 = inlined_call_operand.vmem [shape: f32[1,256], index: 9, kind: input, shape index: {}]   ;;  %s930_s10 = inlined_call_operand.vmem [shape: f32[1,128], index: 10, kind: input, shape index: {}]   ;;  %s931_s11 = inlined_call_operand.vmem [shape: f32[1,128], index: 11, kind: input, shape index: {}]   ;;  %s932_s12 = inlined_call_operand.hbm [shape: f32[16,256], index: 12, kind: output, shape index: {0}]   ;;  %s933_s13 = inlined_call_operand.hbm [shape: f32[16,256], index: 13, kind: output, shape index: {1}]   ;;  %s934_s14 = inlined_call_operand.hbm [shape: f32[16,128], index: 14, kind: output, shape index: {2}]   ;;  %s935_s15 = inlined_call_operand.hbm [shape: f32[16,128], index: 15, kind: output, shape index: {3}]  }
   0x1   :  { %22 = vsyncpa [#allocation6], 0 }
   0x2   :  { %23 = vsyncpa [#allocation9], 0 }
   0x3   :  { %24 = vsyncpa [#allocation12], 0 }
   0x4   :  { %25 = vsyncpa [#allocation4], 0 }
   0x5   :  { %26 = vsyncpa [#allocation16], 0 }
   0x6   :  { %27 = vsyncpa [#allocation19], 0  ;;  %s593_s18 = smov [#allocation5]   ;;  %s594_s20 = smov [#allocation8]  }
   0x7   :  { %s45_s19 = sshll.u32 %s593_s18, 4  ;;  %s69_s21 = sshll.u32 %s594_s20, 4  ;;  %s46_s19 = int_to_ptr.vmem [resolvable:$true] %s45_s19  ;;  %s688_s21 = int_to_ptr.vmem [resolvable:$true] %s69_s21 }
   0x8   :  { %s337_s24 = scalar_lea.hbm %s921_s1, 512 }
   0x9   :  { %p338_p0 = scmp.ne.s32.totalorder %s921_s1, %s337_s24  ;;  %p341_p1 = scmp.lt.u32.totalorder %s337_s24, %s921_s1 }
   0xb   :  { %p343_p2 = pnand %p341_p1, %p338_p0 }
   0xd   :  { %346 = shalt.err (!%p343_p2)
}
   0xe   :  { %s347_s29 = scalar_lea.vmem %s46_s19, 512  ;;  %p352_p4 = scmp.lt.s32.totalorder %s46_s19, %s46_s19 }
   0xf   :  { %p348_p3 = scmp.ne.s32.totalorder %s46_s19, %s347_s29  ;;  %p353_p5 = scmp.lt.s32.totalorder %s347_s29, %s347_s29 }
  0x11   :  { %p354_p6 = por %p353_p5, %p352_p4 }
  0x13   :  { %p355_p7 = pnand %p354_p6, %p348_p3 }
  0x15   :  { %358 = shalt.err (!%p355_p7)
}
  0x16   :  { %s595_s30 = smov 256   ;;  %s596_s16 = smov 16  }
  0x17   :  { %51 = dma.hbm_to_vmem [thread:$0]  %s921_s1, 512, %s46_s19, [#allocation6], %s595_s30, %s595_s30, %s596_s16  }
  0x18   :  { %s359_s23 = scalar_lea.hbm %s923_s3, 512 }
  0x19   :  { %p360_p8 = scmp.ne.s32.totalorder %s923_s3, %s359_s23  ;;  %p363_p9 = scmp.lt.u32.totalorder %s359_s23, %s923_s3 }
  0x1b   :  { %p365_p10 = pnand %p363_p9, %p360_p8 }
  0x1d   :  { %368 = shalt.err (!%p365_p10)
}
  0x1e   :  { %s369_s28 = scalar_lea.vmem %s688_s21, 512  ;;  %p374_p12 = scmp.lt.s32.totalorder %s688_s21, %s688_s21 }
  0x1f   :  { %p370_p11 = scmp.ne.s32.totalorder %s688_s21, %s369_s28  ;;  %p375_p13 = scmp.lt.s32.totalorder %s369_s28, %s369_s28 }
  0x21   :  { %p376_p0 = por %p375_p13, %p374_p12 }
  0x23   :  { %p377_p1 = pnand %p376_p0, %p370_p11 }
  0x25   :  { %380 = shalt.err (!%p377_p1)
}
  0x26   :  { %75 = dma.hbm_to_vmem [thread:$0]  %s923_s3, 512, %s688_s21, [#allocation9], %s595_s30, %s595_s30, %s596_s16  }
  0x27   :  { %s597_s29 = smov [#allocation11]   ;;  %s598_s18 = smov [#allocation2]  }
  0x28   :  { %s95_s17 = sshll.u32 %s597_s29, 4  ;;  %s33_s20 = sshll.u32 %s598_s18, 4  ;;  %s96_s17 = int_to_ptr.vmem [resolvable:$true] %s95_s17  ;;  %s725_s20 = int_to_ptr.vmem [resolvable:$true] %s33_s20 }
  0x29   :  { %s381_s24 = scalar_lea.hbm %s926_s6, 256 }
  0x2a   :  { %p382_p2 = scmp.ne.s32.totalorder %s926_s6, %s381_s24  ;;  %p385_p3 = scmp.lt.u32.totalorder %s381_s24, %s926_s6 }
  0x2c   :  { %p387_p4 = pnand %p385_p3, %p382_p2 }
  0x2e   :  { %390 = shalt.err (!%p387_p4)
}
  0x2f   :  { %s391_s3 = scalar_lea.vmem %s96_s17, 256  ;;  %p396_p6 = scmp.lt.s32.totalorder %s96_s17, %s96_s17 }
  0x30   :  { %p392_p5 = scmp.ne.s32.totalorder %s96_s17, %s391_s3  ;;  %p397_p7 = scmp.lt.s32.totalorder %s391_s3, %s391_s3 }
  0x32   :  { %p398_p8 = por %p397_p7, %p396_p6 }
  0x34   :  { %p399_p9 = pnand %p398_p8, %p392_p5 }
  0x36   :  { %402 = shalt.err (!%p399_p9)
}
  0x37   :  { %s599_s21 = smov 128   ;;  %s600_s1 = smov 8  }
  0x38   :  { %101 = dma.hbm_to_vmem [thread:$0]  %s926_s6, 256, %s96_s17, [#allocation12], %s599_s21, %s599_s21, %s600_s1  }
  0x39   :  { %s403_s23 = scalar_lea.hbm %s920_s0, 512 }
  0x3a   :  { %p404_p10 = scmp.ne.s32.totalorder %s920_s0, %s403_s23  ;;  %p407_p11 = scmp.lt.u32.totalorder %s403_s23, %s920_s0 }
  0x3c   :  { %p409_p12 = pnand %p407_p11, %p404_p10 }
  0x3e   :  { %412 = shalt.err (!%p409_p12)
}
  0x3f   :  { %s413_s28 = scalar_lea.vmem %s725_s20, 512  ;;  %p418_p0 = scmp.lt.s32.totalorder %s725_s20, %s725_s20 }
  0x40   :  { %p414_p13 = scmp.ne.s32.totalorder %s725_s20, %s413_s28  ;;  %p419_p1 = scmp.lt.s32.totalorder %s413_s28, %s413_s28 }
  0x42   :  { %p420_p2 = por %p419_p1, %p418_p0 }
  0x44   :  { %p421_p3 = pnand %p420_p2, %p414_p13 }
  0x46   :  { %424 = shalt.err (!%p421_p3)
}
  0x47   :  { %39 = dma.hbm_to_vmem [thread:$0]  %s920_s0, 512, %s725_s20, [#allocation3], %s595_s30, %s595_s30, %s596_s16  }
  0x48   :  { %s601_s3 = smov [#allocation7]   ;;  %s602_s29 = smov [#allocation10]  }
  0x49   :  { %s57_s19 = sshll.u32 %s601_s3, 4  ;;  %s81_s18 = sshll.u32 %s602_s29, 4  ;;  %s58_s19 = int_to_ptr.vmem [resolvable:$true] %s57_s19  ;;  %s762_s18 = int_to_ptr.vmem [resolvable:$true] %s81_s18 }
  0x4a   :  { %s425_s24 = scalar_lea.hbm %s922_s2, 512 }
  0x4b   :  { %p426_p4 = scmp.ne.s32.totalorder %s922_s2, %s425_s24  ;;  %p429_p5 = scmp.lt.u32.totalorder %s425_s24, %s922_s2 }
  0x4d   :  { %p431_p6 = pnand %p429_p5, %p426_p4 }
  0x4f   :  { %434 = shalt.err (!%p431_p6)
}
  0x50   :  { %s435_s0 = scalar_lea.vmem %s58_s19, 512  ;;  %p440_p8 = scmp.lt.s32.totalorder %s58_s19, %s58_s19 }
  0x51   :  { %p436_p7 = scmp.ne.s32.totalorder %s58_s19, %s435_s0  ;;  %p441_p9 = scmp.lt.s32.totalorder %s435_s0, %s435_s0 }
  0x53   :  { %p442_p10 = por %p441_p9, %p440_p8 }
  0x55   :  { %p443_p11 = pnand %p442_p10, %p436_p7 }
  0x57   :  { %446 = shalt.err (!%p443_p11)
}
  0x58   :  { %63 = dma.hbm_to_vmem [thread:$0]  %s922_s2, 512, %s58_s19, [#allocation6], %s595_s30, %s595_s30, %s596_s16  }
  0x59   :  { %s447_s29 = scalar_lea.hbm %s924_s4, 256 }
  0x5a   :  { %p448_p12 = scmp.ne.s32.totalorder %s924_s4, %s447_s29  ;;  %p451_p13 = scmp.lt.u32.totalorder %s447_s29, %s924_s4 }
  0x5c   :  { %p453_p0 = pnand %p451_p13, %p448_p12 }
  0x5e   :  { %456 = shalt.err (!%p453_p0)
}
  0x5f   :  { %s457_s26 = scalar_lea.vmem %s762_s18, 256  ;;  %p462_p2 = scmp.lt.s32.totalorder %s762_s18, %s762_s18 }
  0x60   :  { %p458_p1 = scmp.ne.s32.totalorder %s762_s18, %s457_s26  ;;  %p463_p3 = scmp.lt.s32.totalorder %s457_s26, %s457_s26 }
  0x62   :  { %p464_p4 = por %p463_p3, %p462_p2 }
  0x64   :  { %p465_p5 = pnand %p464_p4, %p458_p1 }
  0x66   :  { %468 = shalt.err (!%p465_p5)
}
  0x67   :  { %87 = dma.hbm_to_vmem [thread:$0]  %s924_s4, 256, %s762_s18, [#allocation9], %s599_s21, %s599_s21, %s600_s1  }
  0x68   :  { %s603_s27 = smov [#allocation13]   ;;  %s469_s6 = scalar_lea.hbm %s927_s7, 256 }
  0x69   :  { %s107_s28 = sshll.u32 %s603_s27, 4  ;;  %p470_p6 = scmp.ne.s32.totalorder %s927_s7, %s469_s6  ;;  %s108_s28 = int_to_ptr.vmem [resolvable:$true] %s107_s28 }
  0x6a   :  { %p473_p7 = scmp.lt.u32.totalorder %s469_s6, %s927_s7 }
  0x6c   :  { %p475_p8 = pnand %p473_p7, %p470_p6 }
  0x6e   :  { %478 = shalt.err (!%p475_p8)
}
  0x6f   :  { %s479_s23 = scalar_lea.vmem %s108_s28, 256  ;;  %p484_p10 = scmp.lt.s32.totalorder %s108_s28, %s108_s28 }
  0x70   :  { %p480_p9 = scmp.ne.s32.totalorder %s108_s28, %s479_s23  ;;  %p485_p11 = scmp.lt.s32.totalorder %s479_s23, %s479_s23 }
  0x72   :  { %p486_p12 = por %p485_p11, %p484_p10 }
  0x74   :  { %p487_p13 = pnand %p486_p12, %p480_p9 }
  0x76   :  { %490 = shalt.err (!%p487_p13)
}
  0x77   :  { %113 = dma.hbm_to_vmem [thread:$0]  %s927_s7, 256, %s108_s28, [#allocation12], %s599_s21, %s599_s21, %s600_s1  }
  0x78   :  { %579 = dma.done.wait [#allocation3], 512  }
  0x79   :  { %580 = vsyncadd [#allocation3], 4294966784 }
  0x7a   :  { %581 = dma.done.wait [#allocation6], 1024  }
  0x7b   :  { %582 = vsyncadd [#allocation6], 4294966272 }
  0x7c   :  { %583 = dma.done.wait [#allocation9], 768  }
  0x7d   :  { %584 = vsyncadd [#allocation9], 4294966528 }
  0x7e   :  { %585 = dma.done.wait [#allocation12], 512  }
  0x7f   :  { %586 = vsyncadd [#allocation12], 4294966784  ;;  %v152_v0 = vlaneseq  ;;  %v143_v4 = vld [vmem:[%s928_s8] sm:$0x3]  ;;  %v194_v11 = vld [vmem:[#allocation7 + $0x8] sm:$0xff]  ;;  %s604_s7 = smov [#allocation15]  }
  0x80   :  { %v144_v5 = vld [vmem:[%s929_s9] sm:$0x3]  ;;  %v195_v13 = vld [vmem:[#allocation7 + $0x10] sm:$0xff]  ;;  %v196_v14 = vld [vmem:[#allocation7 + $0x18] sm:$0xff]  ;;  %s270_s8 = sshll.u32 %s604_s7, 4  ;;  %s605_s27 = smov [#allocation14]   ;;  %s823_s8 = int_to_ptr.vmem [resolvable:$true] %s270_s8 }
  0x81   :  { %v153_v1 = vshrl.u32 %v152_v0, 7  ;;  %v193_v6 = vld [vmem:[#allocation7] sm:$0xff]  ;;  %v206_v17 = vld [vmem:[#allocation8 + $0x8] sm:$0xff]  ;;  %v207_v19 = vld [vmem:[#allocation8 + $0x10] sm:$0xff]  ;;  %s258_s28 = sshll.u32 %s605_s27, 4  ;;  %s491_s22 = scalar_lea.vmem %s823_s8, 512  ;;  %s834_s28 = int_to_ptr.vmem [resolvable:$true] %s258_s28 }
  0x82   :  { %v205_v12 = vld [vmem:[#allocation8] sm:$0xff]  ;;  %v208_v22 = vld [vmem:[#allocation8 + $0x18] sm:$0xff]  ;;  %v148_v24 = vld [vmem:[#allocation2 + $0x8] sm:$0xff]  ;;  %p492_p0 = scmp.ne.s32.totalorder %s823_s8, %s491_s22  ;;  %p496_p1 = scmp.lt.s32.totalorder %s823_s8, %s823_s8 }
  0x83   :  { %v154_v2 = vsub.s32 0, %v153_v1  ;;  %v158_v3 = vsub.s32 1, %v153_v1  ;;  %v147_v21 = vld [vmem:[#allocation2] sm:$0xff]  ;;  %v149_v25 = vld [vmem:[#allocation2 + $0x10] sm:$0xff]  ;;  %v150_v31 = vld [vmem:[#allocation2 + $0x18] sm:$0xff]  ;;  %p497_p2 = scmp.lt.s32.totalorder %s491_s22, %s491_s22 }
  0x84   :  { %v181_v30 = vld [vmem:[#allocation5] sm:$0xff]  ;;  %v182_v34 = vld [vmem:[#allocation5 + $0x8] sm:$0xff]  ;;  %v183_v43 = vld [vmem:[#allocation5 + $0x10] sm:$0xff] }
  0x85   :  { %v155_v7 = vrot.slane %v143_v4, %v154_v2  ;;  %v170_v8 = vrot.slane %v144_v5, %v154_v2  ;;  %v159_v9 = vrot.slane %v143_v4, %v158_v3  ;;  %v174_v10 = vrot.slane %v144_v5, %v158_v3  ;;  %v320_v37 = vld [vmem:[%s930_s10] ss:$0 sm:$0xff]  ;;  %v184_v44 = vld [vmem:[#allocation5 + $0x18] sm:$0xff]  ;;  %v218_v45 = vld [vmem:[#allocation10 + $0x8] sm:$0xff]  ;;  %p498_p3 = por %p497_p2, %p496_p1 }
  0x86   :  { %v217_v38 = vld [vmem:[#allocation10] sm:$0xff]  ;;  %v241_v51 = vld [vmem:[#allocation11] sm:$0xff]  ;;  %v242_v52 = vld [vmem:[#allocation11 + $0x8] sm:$0xff]  ;;  %v226_v55 = vsub.f32 %v218_v45, %v320_v37 }
  0x87   :  { %v197_v15 = vsub.f32 %v193_v6, %v155_v7  ;;  %v198_v16 = vsub.f32 %v194_v11, %v159_v9  ;;  %v199_v18 = vsub.f32 %v195_v13, %v155_v7  ;;  %v200_v20 = vsub.f32 %v196_v14, %v159_v9  ;;  %v321_v50 = vld [vmem:[%s931_s11] ss:$0 sm:$0xff]  ;;  %v236_v56 = vld [vmem:[%s925_s5 + $0x8] sm:$0xff]  ;;  %s606_s11 = smov [#allocation17]   ;;  %p499_p4 = pnand %p498_p3, %p492_p0 }
  0x88   :  { %v162_v23 = vsub.f32 %v147_v21, %v155_v7  ;;  %v163_v33 = vsub.f32 %v148_v24, %v159_v9  ;;  %v164_v35 = vsub.f32 %v149_v25, %v155_v7  ;;  %v165_v36 = vsub.f32 %v150_v31, %v159_v9  ;;  %v235_v54 = vld [vmem:[%s925_s5] sm:$0xff]  ;;  %s282_s29 = sshll.u32 %s606_s11, 4  ;;  %v248_v63 = vld [vmem:[#allocation13 + $0x8] sm:$0xff]  ;;  %s856_s29 = int_to_ptr.vmem [resolvable:$true] %s282_s29 }
  0x89   :  { %v201_v26 = vmul.f32 %v197_v15, %v170_v8  ;;  %v202_v27 = vmul.f32 %v198_v16, %v174_v10  ;;  %v203_v28 = vmul.f32 %v199_v18, %v170_v8  ;;  %v204_v29 = vmul.f32 %v200_v20, %v174_v10  ;;  %v247_v62 = vld [vmem:[#allocation13] sm:$0xff] }
  0x8a   :  { %v177_v32 = vmul.f32 %v170_v8, %v162_v23  ;;  %v178_v47 = vmul.f32 %v174_v10, %v163_v33  ;;  %v179_v48 = vmul.f32 %v170_v8, %v164_v35  ;;  %v180_v49 = vmul.f32 %v174_v10, %v165_v36 }
  0x8b   :  { %v209_v39 = vmul.f32 %v205_v12, %v201_v26  ;;  %v210_v40 = vmul.f32 %v206_v17, %v202_v27  ;;  %v211_v41 = vmul.f32 %v207_v19, %v203_v28  ;;  %v212_v42 = vmul.f32 %v208_v22, %v204_v29 }
  0x8c   :  { %v185_v46 = vmul.f32 %v181_v30, %v177_v32  ;;  %v225_v53 = vsub.f32 %v217_v38, %v320_v37  ;;  %v243_v57 = vsub.f32 %v241_v51, %v320_v37  ;;  %v244_v58 = vsub.f32 %v242_v52, %v320_v37 }
  0x8d   :  { %213 = vst [vmem:[#allocation15] sm:$0xff] %v209_v39  ;;  %214 = vst [vmem:[#allocation15 + $0x8] sm:$0xff] %v210_v40  ;;  %v186_v59 = vmul.f32 %v182_v34, %v178_v47  ;;  %v187_v60 = vmul.f32 %v183_v43, %v179_v48  ;;  %v188_v61 = vmul.f32 %v184_v44, %v180_v49 }
  0x8e   :  { %215 = vst [vmem:[#allocation15 + $0x10] sm:$0xff] %v211_v41  ;;  %216 = vst [vmem:[#allocation15 + $0x18] sm:$0xff] %v212_v42 }
  0x8f   :  { %189 = vst [vmem:[#allocation14] sm:$0xff] %v185_v46 }
  0x90   :  { %502 = shalt.err (!%p499_p4)
}
  0x91   :  { %s503_s4 = scalar_lea.hbm %s933_s13, 512 }
  0x92   :  { %p504_p5 = scmp.ne.s32.totalorder %s933_s13, %s503_s4  ;;  %p507_p6 = scmp.lt.u32.totalorder %s503_s4, %s933_s13 }
  0x94   :  { %p509_p7 = pnand %p507_p6, %p504_p5 }
  0x96   :  { %512 = shalt.err (!%p509_p7)
}
  0x97   :  { %276 = dma.vmem_to_hbm [thread:$0]  %s823_s8, 512, %s933_s13, [#allocation16], %s595_s30, %s595_s30, %s596_s16   ;;  %v233_v0 = vmul.f32 %v321_v50, %v225_v53  ;;  %v234_v1 = vmul.f32 %v321_v50, %v226_v55  ;;  %v245_v2 = vmul.f32 %v321_v50, %v243_v57  ;;  %v246_v3 = vmul.f32 %v321_v50, %v244_v58  ;;  %190 = vst [vmem:[#allocation14 + $0x8] sm:$0xff] %v186_v59 }
  0x98   :  { %s607_s9 = smov [#allocation18]   ;;  %191 = vst [vmem:[#allocation14 + $0x10] sm:$0xff] %v187_v60  ;;  %192 = vst [vmem:[#allocation14 + $0x18] sm:$0xff] %v188_v61  ;;  %s513_s27 = scalar_lea.vmem %s834_s28, 512 }
  0x99   :  { %s294_s19 = sshll.u32 %s607_s9, 4  ;;  %v237_v4 = vmul.f32 %v235_v54, %v233_v0  ;;  %v238_v5 = vmul.f32 %v236_v56, %v234_v1  ;;  %v249_v6 = vmul.f32 %v247_v62, %v245_v2  ;;  %v250_v7 = vmul.f32 %v248_v63, %v246_v3  ;;  %p514_p8 = scmp.ne.s32.totalorder %s834_s28, %s513_s27  ;;  %s878_s19 = int_to_ptr.vmem [resolvable:$true] %s294_s19 }
  0x9a   :  { %p518_p9 = scmp.lt.s32.totalorder %s834_s28, %s834_s28  ;;  %p519_p10 = scmp.lt.s32.totalorder %s513_s27, %s513_s27 }
  0x9c   :  { %p520_p11 = por %p519_p10, %p518_p9 }
  0x9e   :  { %p521_p12 = pnand %p520_p11, %p514_p8 }
  0xa0   :  { %524 = shalt.err (!%p521_p12)
}
  0xa1   :  { %s525_s0 = scalar_lea.hbm %s932_s12, 512 }
  0xa2   :  { %p526_p13 = scmp.ne.s32.totalorder %s932_s12, %s525_s0  ;;  %p529_p0 = scmp.lt.u32.totalorder %s525_s0, %s932_s12 }
  0xa4   :  { %p531_p1 = pnand %p529_p0, %p526_p13 }
  0xa6   :  { %534 = shalt.err (!%p531_p1)
}
  0xa7   :  { %264 = dma.vmem_to_hbm [thread:$0]  %s834_s28, 512, %s932_s12, [#allocation4], %s595_s30, %s595_s30, %s596_s16   ;;  %239 = vst [vmem:[#allocation17] sm:$0xff] %v237_v4  ;;  %240 = vst [vmem:[#allocation17 + $0x8] sm:$0xff] %v238_v5 }
  0xa8   :  { %251 = vst [vmem:[#allocation18] sm:$0xff] %v249_v6  ;;  %252 = vst [vmem:[#allocation18 + $0x8] sm:$0xff] %v250_v7  ;;  %s535_s22 = scalar_lea.vmem %s856_s29, 256  ;;  %p540_p3 = scmp.lt.s32.totalorder %s856_s29, %s856_s29 }
  0xa9   :  { %p536_p2 = scmp.ne.s32.totalorder %s856_s29, %s535_s22  ;;  %p541_p4 = scmp.lt.s32.totalorder %s535_s22, %s535_s22 }
  0xab   :  { %p542_p5 = por %p541_p4, %p540_p3 }
  0xad   :  { %p543_p6 = pnand %p542_p5, %p536_p2 }
  0xaf   :  { %546 = shalt.err (!%p543_p6)
}
  0xb0   :  { %s547_s4 = scalar_lea.hbm %s934_s14, 256 }
  0xb1   :  { %p548_p7 = scmp.ne.s32.totalorder %s934_s14, %s547_s4  ;;  %p551_p8 = scmp.lt.u32.totalorder %s547_s4, %s934_s14 }
  0xb3   :  { %p553_p9 = pnand %p551_p8, %p548_p7 }
  0xb5   :  { %556 = shalt.err (!%p553_p9)
}
  0xb6   :  { %288 = dma.vmem_to_hbm [thread:$0]  %s856_s29, 256, %s934_s14, [#allocation16], %s599_s21, %s599_s21, %s600_s1  }
  0xb7   :  { %s557_s25 = scalar_lea.vmem %s878_s19, 256  ;;  %p562_p11 = scmp.lt.s32.totalorder %s878_s19, %s878_s19 }
  0xb8   :  { %p558_p10 = scmp.ne.s32.totalorder %s878_s19, %s557_s25  ;;  %p563_p12 = scmp.lt.s32.totalorder %s557_s25, %s557_s25 }
  0xba   :  { %p564_p13 = por %p563_p12, %p562_p11 }
  0xbc   :  { %p565_p0 = pnand %p564_p13, %p558_p10 }
  0xbe   :  { %568 = shalt.err (!%p565_p0)
}
  0xbf   :  { %s569_s7 = scalar_lea.hbm %s935_s15, 256 }
  0xc0   :  { %p570_p1 = scmp.ne.s32.totalorder %s935_s15, %s569_s7  ;;  %p573_p2 = scmp.lt.u32.totalorder %s569_s7, %s935_s15 }
  0xc2   :  { %p575_p3 = pnand %p573_p2, %p570_p1 }
  0xc4   :  { %578 = shalt.err (!%p575_p3)
}
  0xc5   :  { %300 = dma.vmem_to_hbm [thread:$0]  %s878_s19, 256, %s935_s15, [#allocation19], %s599_s21, %s599_s21, %s600_s1  }
  0xc6   :  { %587 = dma.done.wait [#allocation4], 512  }
  0xc7   :  { %588 = vsyncadd [#allocation4], 4294966784 }
  0xc8   :  { %589 = dma.done.wait [#allocation16], 768  }
  0xc9   :  { %590 = vsyncadd [#allocation16], 4294966528 }
  0xca   :  { %591 = dma.done.wait [#allocation19], 256  }
  0xcb   :  { %592 = vsyncadd [#allocation19], 4294967040 }
  0xcc   :  { %313 = vsyncpa [#allocation3], 1 }
  0xcd   :  { %314 = vsyncpa [#allocation6], 1 }
  0xce   :  { %315 = vsyncpa [#allocation9], 1 }
  0xcf   :  { %316 = vsyncpa [#allocation12], 1 }
  0xd0   :  { %317 = vsyncpa [#allocation4], 1 }
  0xd1   :  { %318 = vsyncpa [#allocation16], 1 }
  0xd2   :  { %319 = vsyncpa [#allocation19], 1 }

</bundles_post_ra>
